<compile_context>
chip_gen: v5e
topology: v5e:2x2
jax: 0.10.0
libtpu: 0.0.40
codegen_flags: <defaults>
</compile_context>

<pallas_src>
import jax
import jax.numpy as jnp
from jax.experimental import pallas as pl
from jax.experimental.pallas import tpu as pltpu


def _attention_kernel(q_ref, enc_ref, ctx_ref, scores_ref, m_ref, l_ref, acc_ref):
    # q_ref      : (bb, 1, F)   pre-projected query (hidden @ W), resident over s
    # enc_ref    : (bb, tS, F)  encoder tile for this (batch block, seq tile)
    # ctx_ref    : (bb, F)      context output (same block across s; written last)
    # scores_ref : (bb, tS)     raw scores (exact softmax applied in the wrapper)
    # m_ref      : (bb, 1, 1)   running max      (VMEM scratch)
    # l_ref      : (bb, 1, 1)   running sum      (VMEM scratch)
    # acc_ref    : (bb, 1, F)   running context  (VMEM scratch)
    s_idx = pl.program_id(1)

    @pl.when(s_idx == 0)
    def _():
        m_ref[...] = jnp.full_like(m_ref, -jnp.inf)
        l_ref[...] = jnp.zeros_like(l_ref)
        acc_ref[...] = jnp.zeros_like(acc_ref)

    # Upcast once (no-op for f32): keeps statistics, probabilities and both
    # contractions in f32 even when the DMA'd encoder is bf16 (v5e-safe).
    q = q_ref[...].astype(jnp.float32)
    enc = enc_ref[...].astype(jnp.float32)

    # score[b, 0, s] = sum_f q[b, 0, f] * enc[b, s, f]   (transpose-free)
    s = jnp.einsum("bqf,bsf->bqs", q, enc,
                   preferred_element_type=jnp.float32)        # (bb, 1, tS)
    scores_ref[...] = jnp.squeeze(s, axis=1).astype(scores_ref.dtype)

    # Online-softmax update.
    m_new = jnp.maximum(m_ref[...], jnp.max(s, axis=-1, keepdims=True))
    alpha = jnp.exp(m_ref[...] - m_new)                       # (bb, 1, 1)
    p = jnp.exp(s - m_new)                                    # (bb, 1, tS) f32
    l_ref[...] = alpha * l_ref[...] + jnp.sum(p, axis=-1, keepdims=True)
    acc_ref[...] = alpha * acc_ref[...] + jnp.einsum(
        "bqs,bsf->bqf", p, enc, preferred_element_type=jnp.float32)
    m_ref[...] = m_new

    @pl.when(s_idx == pl.num_programs(1) - 1)
    def _():
        # Exact normalization: one tiny divide per batch block.
        ctx = jnp.squeeze(acc_ref[...] / l_ref[...], axis=1)
        ctx_ref[...] = ctx.astype(ctx_ref.dtype)


def _choose_tiles(B, S, F, itemsize, budget):
    """Pick (bb, tS) so the encoder block fits a per-block VMEM budget."""
    row_bytes = S * F * itemsize

    # Batch block: multiples of 8 (sublane-dense output stores).  Grow only
    # while the block stays within budget AND >= 2 batch-grid steps remain
    # (keeps both v7x TensorCores busy; no-op on single-TC v5e/v6e).
    bb = 8
    while 2 * bb * row_bytes <= budget and pl.cdiv(B, 2 * bb) >= 2:
        bb *= 2

    # Sequence tile: full S if it fits, otherwise the largest multiple-of-128
    # divisor of S that fits (keeps the scores store lane-dense).
    if bb * row_bytes <= budget or S < 128:
        return bb, S
    tS = None
    for mult in range(S // 128, 0, -1):
        cand = mult * 128
        if S % cand == 0 and bb * cand * F * itemsize <= budget:
            tS = cand
            break
    if tS is None:
        # Nothing fits cleanly: smallest lane-dense divisor if one exists,
        # otherwise full S (the VMEM limit below is raised to cover it).
        # TODO(synk): pad/mask ragged S (no multiple-of-128 divisor) so very
        # long, oddly sized sequences can still be S-tiled.
        tS = 128 if S % 128 == 0 else S
    return bb, tS


def attention_forward(hidden, encoder_outs, weight, *,
                      compute_dtype=None,
                      block_bytes_budget=8 * 1024 * 1024):
    """AttentionModule.forward as a Pallas TPU kernel.

    hidden       : (B, 1, H)   query hidden state for this decode step
    encoder_outs : (B, S, 2H)  encoder outputs
    weight       : (H, 2H)     torch nn.Linear(2H, H, bias=False) weight
    compute_dtype: optional (e.g. jnp.bfloat16) dtype for the encoder/query DMA
    Returns (context (B, 2H) f32, attn_scores (B, S) f32).
    """
    B, S, F = encoder_outs.shape
    H = hidden.shape[-1]
    assert hidden.shape == (B, 1, H) and F == 2 * H and weight.shape == (H, F)

    # Algebraic reorder: h @ (E W^T)^T == (h W) @ E^T.  Project the tiny query
    # once here; the kernel never touches the weight and streams the encoder
    # exactly once from HBM.
    q = jnp.einsum("bqh,hf->bqf", hidden.astype(jnp.float32),
                   weight.astype(jnp.float32))                   # (B, 1, F)

    enc = encoder_outs
    if compute_dtype is not None:
        enc = enc.astype(compute_dtype)   # e.g. bf16: halves the HBM read
        q = q.astype(compute_dtype)

    # Tile selection from a per-block VMEM budget.  Sized as f32 regardless of
    # the DMA dtype to leave room for the in-kernel f32 upcast temporary.
    bb, tS = _choose_tiles(B, S, F, 4, block_bytes_budget)
    grid = (pl.cdiv(B, bb), pl.cdiv(S, tS))

    # Explicit VMEM budget: double-buffered blocks + f32 upcast + scratch.
    enc_blk = bb * tS * F * jnp.dtype(enc.dtype).itemsize
    enc_f32 = bb * tS * F * 4
    q_blk = bb * F * jnp.dtype(q.dtype).itemsize
    scores_blk = bb * tS * 4
    ctx_blk = bb * F * 4
    scratch_b = bb * (F + 2) * 4
    vmem_limit = int(1.25 * (2 * (enc_blk + q_blk + scores_blk + ctx_blk)
                             + enc_f32 + scratch_b)) + (2 << 20)
    vmem_limit = max(vmem_limit, 32 * 1024 * 1024)

    context, scores = pl.pallas_call(
        _attention_kernel,
        out_shape=(
            jax.ShapeDtypeStruct((B, F), jnp.float32),
            jax.ShapeDtypeStruct((B, S), jnp.float32),
        ),
        grid_spec=pltpu.PrefetchScalarGridSpec(
            num_scalar_prefetch=0,
            grid=grid,
            in_specs=[
                pl.BlockSpec((bb, 1, F), lambda b, s: (b, 0, 0)),   # q (resident)
                pl.BlockSpec((bb, tS, F), lambda b, s: (b, s, 0)),  # encoder tile
            ],
            out_specs=[
                pl.BlockSpec((bb, F), lambda b, s: (b, 0)),    # context (accum)
                pl.BlockSpec((bb, tS), lambda b, s: (b, s)),   # raw scores
            ],
            scratch_shapes=[
                pltpu.VMEM((bb, 1, 1), jnp.float32),   # running max
                pltpu.VMEM((bb, 1, 1), jnp.float32),   # running sum
                pltpu.VMEM((bb, 1, F), jnp.float32),   # running context
            ],
        ),
        compiler_params=pltpu.CompilerParams(
            dimension_semantics=("parallel", "arbitrary"),
            vmem_limit_bytes=vmem_limit,
        ),
    )(q, enc)

    # Exact softmax over the raw scores.  Tiny (B, S) op (~1/F of the encoder
    # bytes); guarantees the returned attention rows sum to exactly 1.  The
    # in-kernel online-softmax stats are only used to normalize the context.
    attn = jax.nn.softmax(scores, axis=-1)
    return context, attn


def _reference(hidden, encoder_outs, weight):
    # Pure-JAX reference mirroring the PyTorch forward.
    att_score = jnp.einsum("bsf,hf->bsh", encoder_outs, weight)   # (B,S,H)
    score = jnp.einsum("bqh,bsh->bqs", hidden, att_score)         # (B,1,S)
    attn = jax.nn.softmax(jnp.squeeze(score, axis=1), axis=-1)    # (B,S)
    context = jnp.einsum("bsf,bs->bf", encoder_outs, attn)        # (B,2H)
    return context, attn


if __name__ == "__main__":
    # --- Case 1: small decode-step shapes (single block, full-S path). ---
    B, S, H = 2, 8, 32
    F = 2 * H
    k1, k2, k3 = jax.random.split(jax.random.PRNGKey(0), 3)
    hidden = jax.random.normal(k1, (B, 1, H), dtype=jnp.float32)
    enc = jax.random.normal(k2, (B, S, F), dtype=jnp.float32)
    bound = 1.0 / jnp.sqrt(2.0 * H)
    weight = jax.random.uniform(k3, (H, F), dtype=jnp.float32,
                                minval=-bound, maxval=bound)

    ctx, attn = jax.block_until_ready(attention_forward(hidden, enc, weight))
    ref_ctx, ref_attn = _reference(hidden, enc, weight)
    assert ctx.shape == (B, F) and attn.shape == (B, S)
    assert jnp.allclose(attn, ref_attn, atol=2e-3, rtol=2e-3), "attn mismatch"
    assert jnp.allclose(ctx, ref_ctx, atol=2e-3, rtol=2e-3), "context mismatch"
    assert jnp.allclose(jnp.sum(attn, axis=-1), 1.0, atol=1e-5)

    # --- Case 2: ragged batch (B=5) + forced S-tiling (online softmax path). ---
    B, S, H = 5, 256, 64
    F = 2 * H
    k1, k2, k3 = jax.random.split(jax.random.PRNGKey(1), 3)
    hidden = jax.random.normal(k1, (B, 1, H), dtype=jnp.float32)
    enc = jax.random.normal(k2, (B, S, F), dtype=jnp.float32)
    bound = 1.0 / jnp.sqrt(2.0 * H)
    weight = jax.random.uniform(k3, (H, F), dtype=jnp.float32,
                                minval=-bound, maxval=bound)

    ctx, attn = jax.block_until_ready(
        attention_forward(hidden, enc, weight, block_bytes_budget=256 * 1024))
    ref_ctx, ref_attn = _reference(hidden, enc, weight)
    assert jnp.allclose(attn, ref_attn, atol=2e-3, rtol=2e-3), "attn mismatch (tiled)"
    assert jnp.allclose(ctx, ref_ctx, atol=2e-3, rtol=2e-3), "context mismatch (tiled)"

    # --- Case 3: bf16 encoder DMA (half HBM traffic), f32 accumulation. ---
    ctx16, attn16 = jax.block_until_ready(
        attention_forward(hidden, enc, weight, compute_dtype=jnp.bfloat16,
                          block_bytes_budget=256 * 1024))
    assert bool(jnp.all(jnp.isfinite(ctx16))) and bool(jnp.all(jnp.isfinite(attn16)))
    assert jnp.allclose(jnp.sum(attn16, axis=-1), 1.0, atol=1e-5)

    print("KERNEL_OK")
</pallas_src>

<mosaic_0001>
module attributes {stable_mosaic.version = 11 : i64} {
  func.func @_attention_kernel(%arg0: i32, %arg1: i32, %arg2: memref<8x1x64xf32, #tpu.memory_space<vmem>>, %arg3: memref<8x8x64xf32, #tpu.memory_space<vmem>>, %arg4: memref<8x64xf32, #tpu.memory_space<vmem>>, %arg5: memref<8x8xf32, #tpu.memory_space<vmem>>, %arg6: memref<8x1x1xf32, #tpu.memory_space<vmem>>, %arg7: memref<8x1x1xf32, #tpu.memory_space<vmem>>, %arg8: memref<8x1x64xf32, #tpu.memory_space<vmem>>) attributes {dimension_semantics = [#tpu.dimension_semantics<parallel>, #tpu.dimension_semantics<arbitrary>], iteration_bounds = array<i64: 1, 1>, scalar_prefetch = 0 : i64, scratch_operands = 3 : i64, tpu.core_type = #tpu.core_type<tc>, window_params = [{transform_indices = @transform_0, window_bounds = array<i64: 8, 1, 64>}, {transform_indices = @transform_1, window_bounds = array<i64: 8, 8, 64>}, {transform_indices = @transform_2, window_bounds = array<i64: 8, 64>}, {transform_indices = @transform_3, window_bounds = array<i64: 8, 8>}]} {
    %c0_i32 = arith.constant 0 : i32
    %0 = arith.cmpi eq, %arg1, %c0_i32 : i32
    %1 = arith.extui %0 : i1 to i32
    %c0_i32_0 = arith.constant 0 : i32
    %2 = arith.cmpi ne, %1, %c0_i32_0 : i32
    scf.if %2 {
      %cst_34 = arith.constant 0xFF800000 : f32
      %34 = vector.broadcast %cst_34 : f32 to vector<8x1x1xf32>
      %c0_35 = arith.constant 0 : index
      %c0_36 = arith.constant 0 : index
      %c0_37 = arith.constant 0 : index
      %35 = vector.load %arg6[%c0_35, %c0_36, %c0_37] : memref<8x1x1xf32, #tpu.memory_space<vmem>>, vector<8x1x1xf32>
      tpu.vector_store %arg6[%c0_35, %c0_36, %c0_37], %34 {strides = array<i32>} : memref<8x1x1xf32, #tpu.memory_space<vmem>>, vector<8x1x1xf32>,
      %cst_38 = arith.constant 0.000000e+00 : f32
      %36 = vector.broadcast %cst_38 : f32 to vector<8x1x1xf32>
      %c0_39 = arith.constant 0 : index
      %c0_40 = arith.constant 0 : index
      %c0_41 = arith.constant 0 : index
      %37 = vector.load %arg7[%c0_39, %c0_40, %c0_41] : memref<8x1x1xf32, #tpu.memory_space<vmem>>, vector<8x1x1xf32>
      tpu.vector_store %arg7[%c0_39, %c0_40, %c0_41], %36 {strides = array<i32>} : memref<8x1x1xf32, #tpu.memory_space<vmem>>, vector<8x1x1xf32>,
      %cst_42 = arith.constant 0.000000e+00 : f32
      %38 = vector.broadcast %cst_42 : f32 to vector<8x1x64xf32>
      %c0_43 = arith.constant 0 : index
      %c0_44 = arith.constant 0 : index
      %c0_45 = arith.constant 0 : index
      %39 = vector.load %arg8[%c0_43, %c0_44, %c0_45] : memref<8x1x64xf32, #tpu.memory_space<vmem>>, vector<8x1x64xf32>
      tpu.vector_store %arg8[%c0_43, %c0_44, %c0_45], %38 {strides = array<i32>} : memref<8x1x64xf32, #tpu.memory_space<vmem>>, vector<8x1x64xf32>,
    } else {
    }
    %c0 = arith.constant 0 : index
    %c0_1 = arith.constant 0 : index
    %c0_2 = arith.constant 0 : index
    %3 = vector.load %arg2[%c0, %c0_1, %c0_2] : memref<8x1x64xf32, #tpu.memory_space<vmem>>, vector<8x1x64xf32>
    %c0_3 = arith.constant 0 : index
    %c0_4 = arith.constant 0 : index
    %c0_5 = arith.constant 0 : index
    %4 = vector.load %arg3[%c0_3, %c0_4, %c0_5] : memref<8x8x64xf32, #tpu.memory_space<vmem>>, vector<8x8x64xf32>
    "tpu.trace_start"() <{level = 10 : i32, message = "bqf,bsf->bqs"}> : () -> ()
    %cst = arith.constant dense<0.000000e+00> : vector<8x1x8xf32>
    %5 = tpu.matmul %3, %4, %cst {dimension_numbers = #tpu.dot_dimension_numbers<[2], [2], [1], [1], [0, 0, 0, 1, 1, 1], [0], [0]>} : vector<8x1x64xf32>, vector<8x8x64xf32>, vector<8x1x8xf32> -> vector<8x1x8xf32>
    "tpu.trace_stop"() : () -> ()
    %6 = vector.shape_cast %5 : vector<8x1x8xf32> to vector<8x8xf32>
    %c0_6 = arith.constant 0 : index
    %c0_7 = arith.constant 0 : index
    %7 = vector.load %arg5[%c0_6, %c0_7] : memref<8x8xf32, #tpu.memory_space<vmem>>, vector<8x8xf32>
    tpu.vector_store %arg5[%c0_6, %c0_7], %6 {strides = array<i32>} : memref<8x8xf32, #tpu.memory_space<vmem>>, vector<8x8xf32>,
    %c0_8 = arith.constant 0 : index
    %c0_9 = arith.constant 0 : index
    %c0_10 = arith.constant 0 : index
    %8 = vector.load %arg6[%c0_8, %c0_9, %c0_10] : memref<8x1x1xf32, #tpu.memory_space<vmem>>, vector<8x1x1xf32>
    %cst_11 = arith.constant dense<0xFF800000> : vector<8x1xf32>
    %9 = vector.multi_reduction <maximumf>, %5, %cst_11 [2] : vector<8x1x8xf32> to vector<8x1xf32>
    %10 = vector.shape_cast %9 : vector<8x1xf32> to vector<8x1x1xf32>
    %11 = arith.maximumf %8, %10 : vector<8x1x1xf32>
    %c0_12 = arith.constant 0 : index
    %c0_13 = arith.constant 0 : index
    %c0_14 = arith.constant 0 : index
    %12 = vector.load %arg6[%c0_12, %c0_13, %c0_14] : memref<8x1x1xf32, #tpu.memory_space<vmem>>, vector<8x1x1xf32>
    %13 = arith.subf %12, %11 : vector<8x1x1xf32>
    %14 = math.exp %13 : vector<8x1x1xf32>
    %15 = vector.broadcast %11 : vector<8x1x1xf32> to vector<8x1x8xf32>
    %16 = arith.subf %5, %15 : vector<8x1x8xf32>
    %17 = math.exp %16 : vector<8x1x8xf32>
    %c0_15 = arith.constant 0 : index
    %c0_16 = arith.constant 0 : index
    %c0_17 = arith.constant 0 : index
    %18 = vector.load %arg7[%c0_15, %c0_16, %c0_17] : memref<8x1x1xf32, #tpu.memory_space<vmem>>, vector<8x1x1xf32>
    %19 = arith.mulf %14, %18 : vector<8x1x1xf32>
    %cst_18 = arith.constant dense<0.000000e+00> : vector<8x1xf32>
    %20 = vector.multi_reduction <add>, %17, %cst_18 [2] : vector<8x1x8xf32> to vector<8x1xf32>
    %21 = vector.shape_cast %20 : vector<8x1xf32> to vector<8x1x1xf32>
    %22 = arith.addf %19, %21 : vector<8x1x1xf32>
    %c0_19 = arith.constant 0 : index
    %c0_20 = arith.constant 0 : index
    %c0_21 = arith.constant 0 : index
    %23 = vector.load %arg7[%c0_19, %c0_20, %c0_21] : memref<8x1x1xf32, #tpu.memory_space<vmem>>, vector<8x1x1xf32>
    tpu.vector_store %arg7[%c0_19, %c0_20, %c0_21], %22 {strides = array<i32>} : memref<8x1x1xf32, #tpu.memory_space<vmem>>, vector<8x1x1xf32>,
    %c0_22 = arith.constant 0 : index
    %c0_23 = arith.constant 0 : index
    %c0_24 = arith.constant 0 : index
    %24 = vector.load %arg8[%c0_22, %c0_23, %c0_24] : memref<8x1x64xf32, #tpu.memory_space<vmem>>, vector<8x1x64xf32>
    %25 = vector.broadcast %14 : vector<8x1x1xf32> to vector<8x1x64xf32>
    %26 = arith.mulf %25, %24 : vector<8x1x64xf32>
    "tpu.trace_start"() <{level = 10 : i32, message = "bqs,bsf->bqf"}> : () -> ()
    %cst_25 = arith.constant dense<0.000000e+00> : vector<8x1x64xf32>
    %27 = tpu.matmul %17, %4, %cst_25 {dimension_numbers = #tpu.dot_dimension_numbers<[2], [1], [1], [2], [0, 0, 0, 1, 1, 2], [0], [0]>} : vector<8x1x8xf32>, vector<8x8x64xf32>, vector<8x1x64xf32> -> vector<8x1x64xf32>
    "tpu.trace_stop"() : () -> ()
    %28 = arith.addf %26, %27 : vector<8x1x64xf32>
    %c0_26 = arith.constant 0 : index
    %c0_27 = arith.constant 0 : index
    %c0_28 = arith.constant 0 : index
    %29 = vector.load %arg8[%c0_26, %c0_27, %c0_28] : memref<8x1x64xf32, #tpu.memory_space<vmem>>, vector<8x1x64xf32>
    tpu.vector_store %arg8[%c0_26, %c0_27, %c0_28], %28 {strides = array<i32>} : memref<8x1x64xf32, #tpu.memory_space<vmem>>, vector<8x1x64xf32>,
    %c0_29 = arith.constant 0 : index
    %c0_30 = arith.constant 0 : index
    %c0_31 = arith.constant 0 : index
    %30 = vector.load %arg6[%c0_29, %c0_30, %c0_31] : memref<8x1x1xf32, #tpu.memory_space<vmem>>, vector<8x1x1xf32>
    tpu.vector_store %arg6[%c0_29, %c0_30, %c0_31], %11 {strides = array<i32>} : memref<8x1x1xf32, #tpu.memory_space<vmem>>, vector<8x1x1xf32>,
    %c0_i32_32 = arith.constant 0 : i32
    %31 = arith.cmpi eq, %arg1, %c0_i32_32 : i32
    %32 = arith.extui %31 : i1 to i32
    %c0_i32_33 = arith.constant 0 : i32
    %33 = arith.cmpi ne, %32, %c0_i32_33 : i32
    scf.if %33 {
      %c0_34 = arith.constant 0 : index
      %c0_35 = arith.constant 0 : index
      %c0_36 = arith.constant 0 : index
      %34 = vector.load %arg8[%c0_34, %c0_35, %c0_36] : memref<8x1x64xf32, #tpu.memory_space<vmem>>, vector<8x1x64xf32>
      %c0_37 = arith.constant 0 : index
      %c0_38 = arith.constant 0 : index
      %c0_39 = arith.constant 0 : index
      %35 = vector.load %arg7[%c0_37, %c0_38, %c0_39] : memref<8x1x1xf32, #tpu.memory_space<vmem>>, vector<8x1x1xf32>
      %36 = vector.broadcast %35 : vector<8x1x1xf32> to vector<8x1x64xf32>
      %37 = arith.divf %34, %36 : vector<8x1x64xf32>
      %38 = vector.shape_cast %37 : vector<8x1x64xf32> to vector<8x64xf32>
      %c0_40 = arith.constant 0 : index
      %c0_41 = arith.constant 0 : index
      %39 = vector.load %arg4[%c0_40, %c0_41] : memref<8x64xf32, #tpu.memory_space<vmem>>, vector<8x64xf32>
      tpu.vector_store %arg4[%c0_40, %c0_41], %38 {strides = array<i32>} : memref<8x64xf32, #tpu.memory_space<vmem>>, vector<8x64xf32>,
    } else {
    }
    return
  }
  func.func @transform_0(%arg0: i32, %arg1: i32) -> (i32, i32, i32) {
    %c0_i32 = arith.constant 0 : i32
    %c0_i32_0 = arith.constant 0 : i32
    %c0_i32_1 = arith.constant 0 : i32
    return %arg0, %c0_i32, %c0_i32_0 : i32, i32, i32
  }
  func.func @transform_1(%arg0: i32, %arg1: i32) -> (i32, i32, i32) {
    %c0_i32 = arith.constant 0 : i32
    %c0_i32_0 = arith.constant 0 : i32
    return %arg0, %arg1, %c0_i32 : i32, i32, i32
  }
  func.func @transform_2(%arg0: i32, %arg1: i32) -> (i32, i32) {
    %c0_i32 = arith.constant 0 : i32
    %c0_i32_0 = arith.constant 0 : i32
    return %arg0, %c0_i32 : i32, i32
  }
  func.func @transform_3(%arg0: i32, %arg1: i32) -> (i32, i32) {
    %c0_i32 = arith.constant 0 : i32
    return %arg0, %arg1 : i32, i32
  }
}

</mosaic_0001>

<bundles_post_ra>
// kernel: tpu_custom_call.1
= control target key start
LH: loop header
LB: loop body
LE: loop exit
PB: predicated region body
PF: predicated region fallthrough
CT: control target
= control target key end

     0   :  { %9 = vsyncpa [#allocation6], 0  ;;  %s1501_s0 = inlined_call_operand.hbm [shape: f32[2,1,64], index: 0, kind: input, shape index: {}]   ;;  %s1502_s1 = inlined_call_operand.hbm [shape: f32[2,8,64], index: 1, kind: input, shape index: {}]   ;;  %s1503_s2 = inlined_call_operand.hbm [shape: f32[2,64], index: 2, kind: output, shape index: {0}]   ;;  %s1504_s3 = inlined_call_operand.hbm [shape: f32[2,8], index: 3, kind: output, shape index: {1}]  }
   0x1   :  { %10 = vsyncpa [#allocation9], 0 }
   0x2   :  { %11 = vsyncpa [#allocation7], 0 }
   0x3   :  { %12 = vsyncpa [#allocation12], 0 }
   0x4   :  { %16 = vsyncadd [#allocation6], 96  ;;  %s17_s14 = sshll.u32 %s1501_s0, 4  ;;  %s1244_s15 = smov [#allocation5]   ;;  %s18_s14 = int_to_ptr.hbm [resolvable:$true] %s17_s14 }
   0x5   :  { %s19_s16 = sshll.u32 %s1244_s15, 4  ;;  %s1245_s17 = smov 16   ;;  %s20_s16 = int_to_ptr.vmem [resolvable:$true] %s19_s16 }
   0x6   :  { %s1246_s18 = smov 1  }
   0x7   :  { %25 = dma.hbm_to_vmem [thread:$0]  %s18_s14, 32, %s20_s16, [#allocation6], %s1245_s17, %s1245_s17, %s1246_s18  }
   0x8   :  { %29 = vsyncadd [#allocation9], 768  ;;  %s30_s21 = sshll.u32 %s1502_s1, 4  ;;  %s1247_s22 = smov [#allocation8]   ;;  %s31_s21 = int_to_ptr.hbm [resolvable:$true] %s30_s21 }
   0x9   :  { %s32_s23 = sshll.u32 %s1247_s22, 4  ;;  %s1248_s24 = smov 128   ;;  %s33_s23 = int_to_ptr.vmem [resolvable:$true] %s32_s23 }
   0xa   :  { %s1249_s25 = smov 8  }
   0xb   :  { %38 = dma.hbm_to_vmem [thread:$0]  %s31_s21, 256, %s33_s23, [#allocation9], %s1248_s24, %s1248_s24, %s1249_s25  }
   0xc   :  { %1236 = dma.done.wait [#allocation6], 128  }
   0xd   :  { %1237 = vsyncadd [#allocation6], 4294967168 }
   0xe   :  { %1238 = dma.done.wait [#allocation9], 1024  }
   0xf   :  { %1239 = vsyncadd [#allocation9], 4294966272  ;;  %vm93_vm0 = vcmask 523264   ;;  %v85_v0 = vld [vmem:[#allocation8] sm:$0xff]  ;;  %v87_v1 = vld [vmem:[#allocation8 + $0x10] sm:$0xff]  ;;  %vm51_vm1 = vcmask 0  }
  0x10   :  { %v86_v2 = vld [vmem:[#allocation8 + $0x8] sm:$0xff]  ;;  %1052 = vmatpush.xpose.msk.msra.mxu0 %vm93_vm0, %v85_v0  ;;  %1056 = vmatpush.xpose.msk.msra.mxu2 %vm93_vm0, %v87_v1  ;;  %v88_v3 = vld [vmem:[#allocation8 + $0x18] sm:$0xff]  ;;  %v91_v6 = vld [vmem:[#allocation8 + $0x30] sm:$0xff]  ;;  %v1250_v16 = vmov -inf   ;;  %vm342_vm2 = vcmask 57344   ;;  %vm311_vm3 = vcmask 1041409  }
  0x11   :  { %v77_v4 = vld [vmem:[#allocation5] sm:$0x1]  ;;  %v79_v5 = vld [vmem:[#allocation5 + $0x2] sm:$0x1]  ;;  %1054 = vmatpush.xpose.msk.msra.mxu1 %vm93_vm0, %v86_v2  ;;  %1058 = vmatpush.xpose.msk.msra.mxu3 %vm93_vm0, %v88_v3  ;;  %v78_v7 = vld [vmem:[#allocation5 + $0x1] sm:$0x1] }
  0x12   :  { %v80_v8 = vld [vmem:[#allocation5 + $0x3] sm:$0x1]  ;;  %v89_v9 = vld [vmem:[#allocation8 + $0x20] sm:$0xff]  ;;  %v90_v10 = vld [vmem:[#allocation8 + $0x28] sm:$0xff]  ;;  %52 = vst.msk [vmem:[#allocation2] sm:$0x1] %vm51_vm1, %v1250_v16 }
  0x13   :  { %1053 = vmatmul.msk.f32.vlgmr.msra.gmra.mxu0 %vm93_vm0, %v77_v4  ;;  %1057 = vmatmul.msk.f32.vlgmr.msra.gmra.mxu2 %vm93_vm0, %v79_v5  ;;  %v92_v11 = vld [vmem:[#allocation8 + $0x38] sm:$0xff]  ;;  %53 = vst.msk [vmem:[#allocation2 + $0x1] sm:$0x1] %vm51_vm1, %v1250_v16  ;;  %vm314_vm4 = vcmask 1042434   ;;  %vm317_vm5 = vcmask 1043459   ;;  %vm320_vm6 = vcmask 1044484  }
  0x14   :  { %1064 = vmatpush.xpose.msk.msrb.mxu2 %vm93_vm0, %v91_v6  ;;  %1055 = vmatmul.msk.f32.vlgmr.msra.gmra.mxu1 %vm93_vm0, %v78_v7  ;;  %v81_v12 = vld [vmem:[#allocation5 + $0x4] sm:$0x1]  ;;  %v83_v13 = vld [vmem:[#allocation5 + $0x6] sm:$0x1]  ;;  %v82_v14 = vld [vmem:[#allocation5 + $0x5] sm:$0x1] }
  0x15   :  { %1059 = vmatmul.msk.f32.vlgmr.msra.gmra.mxu3 %vm93_vm0, %v80_v8  ;;  %1060 = vmatpush.xpose.msk.msrb.mxu0 %vm93_vm0, %v89_v9  ;;  %v84_v15 = vld [vmem:[#allocation5 + $0x7] sm:$0x1]  ;;  %54 = vst.msk [vmem:[#allocation2 + $0x2] sm:$0x1] %vm51_vm1, %v1250_v16  ;;  %vm323_vm7 = vcmask 1045509   ;;  %vm326_vm8 = vcmask 1046534  }
  0x16   :  { %1062 = vmatpush.xpose.msk.msrb.mxu1 %vm93_vm0, %v90_v10  ;;  %1066 = vmatpush.xpose.msk.msrb.mxu3 %vm93_vm0, %v92_v11  ;;  %55 = vst.msk [vmem:[#allocation2 + $0x3] sm:$0x1] %vm51_vm1, %v1250_v16  ;;  %vm329_vm9 = vcmask 1047559   ;;  %vm332_vm10 = vcmask 64512   ;;  %v1251_v47 = vmov 0   ;;  %v1252_v48 = vmov 0.0  }
  0x17   :  { %56 = vst.msk [vmem:[#allocation2 + $0x4] sm:$0x1] %vm51_vm1, %v1250_v16  ;;  %1091 = vset.pattern.permute.xlu1 %v1251_v47  ;;  %1089 = vset.pattern.permute.xlu2 %v1251_v47  ;;  %vm68_vm11 = vcmask 516096  }
  0x18   :  { %656 = vmatpush.msra.mxu2 %v87_v1  ;;  %57 = vst.msk [vmem:[#allocation2 + $0x5] sm:$0x1] %vm51_vm1, %v1250_v16  ;;  %1090 = vset.pattern.permute.xlu0 %v1251_v47 }
  0x19   :  { %610 = vmatpush.msra.mxu0 %v85_v0  ;;  %58 = vst.msk [vmem:[#allocation2 + $0x6] sm:$0x1] %vm51_vm1, %v1250_v16  ;;  %v334_v49 = vld [vmem:[#allocation2] sm:$0x1] }
  0x1a   :  { %633 = vmatpush.msra.mxu1 %v86_v2  ;;  %679 = vmatpush.msra.mxu3 %v88_v3  ;;  %59 = vst.msk [vmem:[#allocation2 + $0x7] sm:$0x1] %vm51_vm1, %v1250_v16  ;;  %v335_v54 = vld [vmem:[#allocation2 + $0x1] sm:$0x1] }
  0x1b   :  { %1061 = vmatmul.msk.f32.vlgmr.msrb.gmra.mxu0 %vm93_vm0, %v81_v12  ;;  %1065 = vmatmul.msk.f32.vlgmr.msrb.gmra.mxu2 %vm93_vm0, %v83_v13  ;;  %62 = vst.msk [vmem:[#allocation3 + $0x2] sm:$0x1] %vm51_vm1, %v1252_v48 }
  0x1c   :  { %1063 = vmatmul.msk.f32.vlgmr.msrb.gmra.mxu1 %vm93_vm0, %v82_v14  ;;  %748 = vmatpush.msrb.mxu2 %v91_v6  ;;  %60 = vst.msk [vmem:[#allocation3] sm:$0x1] %vm51_vm1, %v1252_v48  ;;  %v336_v52 = vld [vmem:[#allocation2 + $0x2] sm:$0x1] }
  0x1d   :  { %1067 = vmatmul.msk.f32.vlgmr.msrb.gmra.mxu3 %vm93_vm0, %v84_v15  ;;  %702 = vmatpush.msrb.mxu0 %v89_v9  ;;  %61 = vst.msk [vmem:[#allocation3 + $0x1] sm:$0x1] %vm51_vm1, %v1252_v48  ;;  %v337_v59 = vld [vmem:[#allocation2 + $0x3] sm:$0x1] }
  0x1e   :  { %771 = vmatpush.msrb.mxu3 %v92_v11  ;;  %725 = vmatpush.msrb.mxu1 %v90_v10  ;;  %63 = vst.msk [vmem:[#allocation3 + $0x3] sm:$0x1] %vm51_vm1, %v1252_v48  ;;  %v338_v8 = vld [vmem:[#allocation2 + $0x4] sm:$0x1] }
  0x1f   :  { %64 = vst.msk [vmem:[#allocation3 + $0x4] sm:$0x1] %vm51_vm1, %v1252_v48  ;;  %v1369_v0 = vld [vmem:[#allocation2 + $0x5] sm:$0x1] }
  0x20   :  { %65 = vst.msk [vmem:[#allocation3 + $0x5] sm:$0x1] %vm51_vm1, %v1252_v48  ;;  %v1367_v60 = vld [vmem:[#allocation2 + $0x6] sm:$0x1] }
  0x21   :  { %66 = vst.msk [vmem:[#allocation3 + $0x6] sm:$0x1] %vm51_vm1, %v1252_v48  ;;  %v1386_v7 = vld [vmem:[#allocation2 + $0x7] sm:$0x1] }
  0x22   :  { %67 = vst.msk [vmem:[#allocation3 + $0x7] sm:$0x1] %vm51_vm1, %v1252_v48 }
  0x23   :  { %71 = vst.msk [vmem:[#allocation4 + $0x2] sm:$0x1] %vm68_vm11, %v1252_v48 }
  0x24   :  { %69 = vst.msk [vmem:[#allocation4] sm:$0x1] %vm68_vm11, %v1252_v48 }
  0x25   :  { %70 = vst.msk [vmem:[#allocation4 + $0x1] sm:$0x1] %vm68_vm11, %v1252_v48 }
  0x26   :  { %72 = vst.msk [vmem:[#allocation4 + $0x3] sm:$0x1] %vm68_vm11, %v1252_v48 }
  0x27   :  { %73 = vst.msk [vmem:[#allocation4 + $0x4] sm:$0x1] %vm68_vm11, %v1252_v48 }
  0x28   :  { %74 = vst.msk [vmem:[#allocation4 + $0x5] sm:$0x1] %vm68_vm11, %v1252_v48 }
  0x29   :  { %75 = vst.msk [vmem:[#allocation4 + $0x6] sm:$0x1] %vm68_vm11, %v1252_v48 }
  0x2a   :  { %76 = vst.msk [vmem:[#allocation4 + $0x7] sm:$0x1] %vm68_vm11, %v1252_v48 }
  0x90   :  { %v1306_v17 = vpop.f32.mrf.mxu0 }
  0x91   :  { %v1309_v18 = vpop.f32.mrf.mxu1  ;;  %v343_v19 = vsel %vm342_vm2, %v1306_v17, -inf }
  0x92   :  { %v310_v20 = vrot.slane %v1309_v18, 7  ;;  %344 = vmax.xlane.f32.xlu1 %v343_v19  ;;  %v346_v26 = vsel %vm342_vm2, %v1309_v18, -inf }
  0x94   :  { %v312_v21 = vsel %vm311_vm3, %v310_v20, %v1306_v17 }
  0x96   :  { %v1315_v22 = vpop.f32.mrf.mxu2 }
  0x97   :  { %v313_v23 = vrot.slane %v1315_v22, 6  ;;  %v349_v25 = vsel %vm342_vm2, %v1315_v22, -inf }
  0x98   :  { %v1318_v24 = vpop.f32.mrf.mxu3  ;;  %350 = vmax.xlane.f32.xlu0 %v349_v25  ;;  %v1325_v28 = vpop.f32.mrf.mxu0 }
  0x99   :  { %v316_v27 = vrot.slane %v1318_v24, 5  ;;  %v315_v29 = vsel %vm314_vm4, %v313_v23, %v312_v21  ;;  %v319_v30 = vrot.slane %v1325_v28, 4  ;;  %v1328_v31 = vpop.f32.mrf.mxu1  ;;  %v352_v35 = vsel %vm342_vm2, %v1318_v24, -inf }
  0x9a   :  { %347 = vmax.xlane.f32.xlu1 %v346_v26  ;;  %v322_v33 = vrot.slane %v1328_v31, 3  ;;  %v358_v40 = vsel %vm342_vm2, %v1328_v31, -inf  ;;  %v355_v46 = vsel %vm342_vm2, %v1325_v28, -inf }
  0x9b   :  { %v318_v32 = vsel %vm317_vm5, %v316_v27, %v315_v29 }
  0x9c   :  { %v321_v34 = vsel %vm320_vm6, %v319_v30, %v318_v32 }
  0x9d   :  { %v324_v41 = vsel %vm323_vm7, %v322_v33, %v321_v34 }
  0x9e   :  { %v1333_v36 = vpop.f32.mrf.mxu2 }
  0x9f   :  { %v325_v37 = vrot.slane %v1333_v36, 2  ;;  %v361_v39 = vsel %vm342_vm2, %v1333_v36, -inf }
  0xa0   :  { %v1336_v38 = vpop.f32.mrf.mxu3  ;;  %353 = vmax.xlane.f32.xlu0 %v352_v35  ;;  %362 = vmax.xlane.f32.xlu2 %v361_v39 }
  0xa1   :  { %v328_v42 = vrot.slane %v1336_v38, 1  ;;  %v327_v43 = vsel %vm326_vm8, %v325_v37, %v324_v41  ;;  %v364_v45 = vsel %vm342_vm2, %v1336_v38, -inf }
  0xa2   :  { %359 = vmax.xlane.f32.xlu1 %v358_v40 }
  0xa3   :  { %v330_v44 = vsel %vm329_vm9, %v328_v42, %v327_v43 }
  0xa4   :  { %333 = vst.msk [vmem:[#allocation11] sm:$0xff] %vm332_vm10, %v330_v44 }
  0xa8   :  { %365 = vmax.xlane.f32.xlu2 %v364_v45  ;;  %356 = vmax.xlane.f32.xlu0 %v355_v46 }
 0x105   :  { %v345_v50 = vpop.xlane.xlu1 %344 }
 0x106   :  { %v367_v51 = vmax.f32 %v334_v49, %v345_v50 }
 0x108   :  { %793 = vst.msk [vmem:[#allocation2] sm:$0x1] %vm51_vm1, %v367_v51  ;;  %401 = vperm.xlu1 %1091, %v367_v51   ;;  %v375_v19 = vsub.f32 %v334_v49, %v367_v51 }
 0x10a   :  { %v383_v23 = vmul.f32 1.442695, %v375_v19 }
 0x10b   :  { %v351_v53 = vpop.xlane.xlu0 %350 }
 0x10c   :  { %v369_v55 = vmax.f32 %v336_v52, %v351_v53 }
 0x10d   :  { %v348_v56 = vpop.xlane.xlu1 %347 }
 0x10e   :  { %795 = vst.msk [vmem:[#allocation2 + $0x2] sm:$0x1] %vm51_vm1, %v369_v55  ;;  %413 = vperm.xlu2 %1089, %v369_v55   ;;  %v368_v57 = vmax.f32 %v335_v54, %v348_v56  ;;  %v377_v58 = vsub.f32 %v336_v52, %v369_v55 }
 0x110   :  { %794 = vst.msk [vmem:[#allocation2 + $0x1] sm:$0x1] %vm51_vm1, %v368_v57  ;;  %v387_v61 = vmul.f32 1.442695, %v377_v58  ;;  %v376_v16 = vsub.f32 %v335_v54, %v368_v57 }
 0x112   :  { %1092 = vpow2.f32 %v387_v61  ;;  %v385_v21 = vmul.f32 1.442695, %v376_v16 }
 0x113   :  { %v354_v62 = vpop.xlane.xlu0 %353  ;;  %v363_v63 = vpop.xlane.xlu2 %362 }
 0x114   :  { %v370_v1 = vmax.f32 %v337_v59, %v354_v62  ;;  %v1372_v2 = vmax.f32 %v1367_v60, %v363_v63 }
 0x115   :  { %v360_v3 = vpop.xlane.xlu1 %359 }
 0x116   :  { %796 = vst.msk [vmem:[#allocation2 + $0x3] sm:$0x1] %vm51_vm1, %v370_v1  ;;  %v381_v4 = vsub.f32 %v1367_v60, %v1372_v2  ;;  %419 = vperm.xlu0 %1090, %v370_v1   ;;  %407 = vperm.xlu2 %1089, %v368_v57   ;;  %v1378_v5 = vmax.f32 %v1369_v0, %v360_v3 }
 0x117   :  { %799 = vst.msk [vmem:[#allocation2 + $0x6] sm:$0x1] %vm51_vm1, %v1372_v2  ;;  %v378_v25 = vsub.f32 %v337_v59, %v370_v1 }
 0x118   :  { %v380_v6 = vsub.f32 %v1369_v0, %v1378_v5  ;;  %798 = vst.msk [vmem:[#allocation2 + $0x5] sm:$0x1] %vm51_vm1, %v1378_v5  ;;  %v1391_v13 = vpop.eup %1092 }
 0x119   :  { %v389_v27 = vmul.f32 1.442695, %v378_v25 }
 0x11b   :  { %v366_v9 = vpop.xlane.xlu2 %365  ;;  %v357_v10 = vpop.xlane.xlu0 %356 }
 0x11c   :  { %v1389_v11 = vmax.f32 %v1386_v7, %v366_v9  ;;  %v371_v12 = vmax.f32 %v338_v8, %v357_v10 }
 0x11e   :  { %v382_v14 = vsub.f32 %v1386_v7, %v1389_v11  ;;  %800 = vst.msk [vmem:[#allocation2 + $0x7] sm:$0x1] %vm51_vm1, %v1389_v11  ;;  %550 = vperm.xlu0 %1090, %v1391_v13   ;;  %437 = vperm.xlu2 %1089, %v1372_v2   ;;  %v379_v15 = vsub.f32 %v338_v8, %v371_v12  ;;  %v532_v2 = vld [vmem:[#allocation4 + $0x4] sm:$0x1] }
 0x11f   :  { %443 = vperm.xlu1 %1091, %v1389_v11   ;;  %797 = vst.msk [vmem:[#allocation2 + $0x4] sm:$0x1] %vm51_vm1, %v371_v12  ;;  %v393_v11 = vmul.f32 1.442695, %v380_v6 }
 0x120   :  { %v391_v20 = vmul.f32 1.442695, %v379_v15 }
 0x122   :  { %1094 = vpow2.f32 %v391_v20 }
 0x123   :  { %1096 = vpow2.f32 %v385_v21 }
 0x124   :  { %1098 = vpow2.f32 %v383_v23 }
 0x125   :  { %1100 = vpow2.f32 %v389_v27 }
 0x126   :  { %425 = vperm.xlu2 %1089, %v371_v12  }
 0x127   :  { %431 = vperm.xlu1 %1091, %v1378_v5  }
 0x128   :  { %v1402_v26 = vpop.eup %1094 }
 0x129   :  { %562 = vperm.xlu0 %1090, %v1402_v26   ;;  %v1405_v29 = vpop.eup %1096 }
 0x12a   :  { %v1407_v30 = vpop.eup %1098 }
 0x12b   :  { %v1411_v32 = vpop.eup %1100 }
 0x12e   :  { %544 = vperm.xlu2 %1089, %v1405_v29  }
 0x12f   :  { %538 = vperm.xlu1 %1091, %v1407_v30  }
 0x137   :  { %556 = vperm.xlu1 %1091, %v1411_v32  }
 0x168   :  { %v414_v33 = vpop.permute.xlu2 %413 }
 0x169   :  { %v416_v34 = vperm.slane %v414_v33, 0 }
 0x16b   :  { %v449_v35 = vsub.f32 %v1315_v22, %v416_v34 }
 0x16d   :  { %v459_v37 = vmul.f32 1.442695, %v449_v35 }
 0x16f   :  { %1102 = vpow2.f32 %v459_v37 }
 0x170   :  { %v408_v39 = vpop.permute.xlu2 %407 }
 0x171   :  { %v410_v40 = vperm.slane %v408_v39, 0 }
 0x173   :  { %v448_v41 = vsub.f32 %v1309_v18, %v410_v40 }
 0x175   :  { %v1103_v42 = vpop.eup %1102  ;;  %v457_v43 = vmul.f32 1.442695, %v448_v41  ;;  %v472_v41 = vld [vmem:[#allocation3 + $0x1] sm:$0x1] }
 0x176   :  { %1070 = vmatmul.msk.f32.vlgmr.msra.gmra.mxu2 %vm332_vm10, %v1103_v42  ;;  %v493_v44 = vsel %vm342_vm2, %v1103_v42, 0.0  ;;  %v480_v42 = vmul.f32 %v1405_v29, %v472_v41 }
 0x177   :  { %1104 = vpow2.f32 %v457_v43  ;;  %494 = vadd.xlane.f32.xlu1 %v493_v44 }
 0x178   :  { %v438_v45 = vpop.permute.xlu2 %437 }
 0x179   :  { %v440_v46 = vperm.slane %v438_v45, 0 }
 0x17a   :  { %v402_v22 = vpop.permute.xlu1 %401 }
 0x17b   :  { %v453_v47 = vsub.f32 %v1333_v36, %v440_v46  ;;  %v404_v48 = vperm.slane %v402_v22, 0 }
 0x17d   :  { %v1105_v49 = vpop.eup %1104  ;;  %v467_v50 = vmul.f32 1.442695, %v453_v47  ;;  %v447_v51 = vsub.f32 %v1306_v17, %v404_v48  ;;  %v530_v47 = vld [vmem:[#allocation4 + $0x2] sm:$0x1] }
 0x17e   :  { %1069 = vmatmul.msk.f32.vlgmr.msra.gmra.mxu1 %vm332_vm10, %v1105_v49  ;;  %v490_v18 = vsel %vm342_vm2, %v1105_v49, 0.0 }
 0x17f   :  { %1106 = vpow2.f32 %v467_v50  ;;  %v455_v52 = vmul.f32 1.442695, %v447_v51  ;;  %491 = vadd.xlane.f32.xlu2 %v490_v18  ;;  %v471_v50 = vld [vmem:[#allocation3] sm:$0x1] }
 0x180   :  { %v426_v53 = vpop.permute.xlu2 %425 }
 0x181   :  { %1108 = vpow2.f32 %v455_v52  ;;  %v428_v54 = vperm.slane %v426_v53, 0 }
 0x183   :  { %v451_v55 = vsub.f32 %v1325_v28, %v428_v54  ;;  %v479_v54 = vmul.f32 %v1407_v30, %v471_v50  ;;  %v395_v30 = vmul.f32 1.442695, %v381_v4 }
 0x185   :  { %v1107_v56 = vpop.eup %1106  ;;  %v463_v57 = vmul.f32 1.442695, %v451_v55 }
 0x186   :  { %1074 = vmatmul.msk.f32.vlgmr.msrb.gmra.mxu2 %vm332_vm10, %v1107_v56  ;;  %v505_v21 = vsel %vm342_vm2, %v1107_v56, 0.0 }
 0x187   :  { %v1109_v36 = vpop.eup %1108  ;;  %1110 = vpow2.f32 %v463_v57 }
 0x188   :  { %v420_v58 = vpop.permute.xlu0 %419  ;;  %1068 = vmatmul.msk.f32.vlgmr.msra.gmra.mxu0 %vm332_vm10, %v1109_v36  ;;  %v487_v17 = vsel %vm342_vm2, %v1109_v36, 0.0  ;;  %v545_v35 = vpop.permute.xlu2 %544 }
 0x189   :  { %v422_v59 = vperm.slane %v420_v58, 0  ;;  %488 = vadd.xlane.f32.xlu0 %v487_v17  ;;  %v547_v48 = vperm.slane %v545_v35, 0  ;;  %v475_v58 = vld [vmem:[#allocation3 + $0x4] sm:$0x1]  ;;  %v528_v17 = vld [vmem:[#allocation4] sm:$0x1] }
 0x18b   :  { %v450_v61 = vsub.f32 %v1318_v24, %v422_v59  ;;  %v483_v59 = vmul.f32 %v1402_v26, %v475_v58 }
 0x18d   :  { %v1111_v62 = vpop.eup %1110  ;;  %v461_v63 = vmul.f32 1.442695, %v450_v61 }
 0x18e   :  { %v499_v28 = vsel %vm342_vm2, %v1111_v62, 0.0 }
 0x18f   :  { %1112 = vpow2.f32 %v461_v63  ;;  %v397_v63 = vmul.f32 1.442695, %v382_v14 }
 0x190   :  { %1072 = vmatmul.msk.f32.vlgmr.msrb.gmra.mxu0 %vm332_vm10, %v1111_v62  ;;  %v551_v40 = vpop.permute.xlu0 %550 }
 0x191   :  { %v444_v1 = vpop.permute.xlu1 %443  ;;  %500 = vadd.xlane.f32.xlu0 %v499_v28  ;;  %v553_v45 = vperm.slane %v551_v40, 0 }
 0x192   :  { %v446_v3 = vperm.slane %v444_v1, 0 }
 0x193   :  { %v586_v49 = vmul.f32 %v553_v45, %v530_v47 }
 0x194   :  { %v454_v8 = vsub.f32 %v1336_v38, %v446_v3 }
 0x195   :  { %v1113_v9 = vpop.eup %1112 }
 0x196   :  { %v469_v10 = vmul.f32 1.442695, %v454_v8  ;;  %1071 = vmatmul.msk.f32.vlgmr.msra.gmra.mxu3 %vm332_vm10, %v1113_v9  ;;  %v496_v12 = vsel %vm342_vm2, %v1113_v9, 0.0  ;;  %v474_v9 = vld [vmem:[#allocation3 + $0x3] sm:$0x1] }
 0x197   :  { %497 = vadd.xlane.f32.xlu2 %v496_v12  ;;  %v482_v60 = vmul.f32 %v1411_v32, %v474_v9 }
 0x198   :  { %1114 = vpow2.f32 %v469_v10 }
 0x199   :  { %v432_v24 = vpop.permute.xlu1 %431 }
 0x19a   :  { %v434_v15 = vperm.slane %v432_v24, 0 }
 0x19b   :  { %v563_v46 = vpop.permute.xlu0 %562 }
 0x19c   :  { %v452_v16 = vsub.f32 %v1328_v31, %v434_v15  ;;  %v473_v31 = vld [vmem:[#allocation3 + $0x2] sm:$0x1]  ;;  %v565_v26 = vperm.slane %v563_v46, 0 }
 0x19d   :  { %v481_v34 = vmul.f32 %v1391_v13, %v473_v31  ;;  %v529_v13 = vld [vmem:[#allocation4 + $0x1] sm:$0x1] }
 0x19e   :  { %v1115_v19 = vpop.eup %1114  ;;  %v465_v20 = vmul.f32 1.442695, %v452_v16  ;;  %v585_v52 = vmul.f32 %v547_v48, %v529_v13  ;;  %v588_v7 = vmul.f32 %v565_v26, %v532_v2  ;;  %v477_v16 = vld [vmem:[#allocation3 + $0x6] sm:$0x1] }
 0x19f   :  { %1075 = vmatmul.msk.f32.vlgmr.msrb.gmra.mxu3 %vm332_vm10, %v1115_v19  ;;  %506 = vadd.xlane.f32.xlu2 %v505_v21  ;;  %v508_v38 = vsel %vm342_vm2, %v1115_v19, 0.0 }
 0x1a0   :  { %1116 = vpow2.f32 %v465_v20  ;;  %509 = vadd.xlane.f32.xlu0 %v508_v38  ;;  %v478_v20 = vld [vmem:[#allocation3 + $0x7] sm:$0x1] }
 0x1a1   :  { %v539_v27 = vpop.permute.xlu1 %538  ;;  %1118 = vpow2.f32 %v395_v30 }
 0x1a2   :  { %v541_v36 = vperm.slane %v539_v27, 0  ;;  %1120 = vpow2.f32 %v397_v63  ;;  %v531_v27 = vld [vmem:[#allocation4 + $0x3] sm:$0x1] }
 0x1a3   :  { %1122 = vpow2.f32 %v393_v11 }
 0x1a4   :  { %v584_v62 = vmul.f32 %v541_v36, %v528_v17 }
 0x1a6   :  { %v1117_v23 = vpop.eup %1116 }
 0x1a7   :  { %1073 = vmatmul.msk.f32.vlgmr.msrb.gmra.mxu1 %vm332_vm10, %v1117_v23  ;;  %v502_v25 = vsel %vm342_vm2, %v1117_v23, 0.0  ;;  %v1119_v12 = vpop.eup %1118 }
 0x1a8   :  { %503 = vadd.xlane.f32.xlu1 %v502_v25  ;;  %v1121_v19 = vpop.eup %1120  ;;  %v485_v32 = vmul.f32 %v1119_v12, %v477_v16 }
 0x1a9   :  { %v1454_v33 = vpop.permute.xlu1 %556  ;;  %v486_v38 = vmul.f32 %v1121_v19, %v478_v20  ;;  %v1123_v31 = vpop.eup %1122 }
 0x1aa   :  { %v559_v0 = vperm.slane %v1454_v33, 0 }
 0x1ac   :  { %v587_v35 = vmul.f32 %v559_v0, %v531_v27 }
 0x1ea   :  { %v495_v37 = vpop.xlane.xlu1 %494 }
 0x1eb   :  { %v513_v39 = vadd.f32 %v495_v37, %v481_v34  ;;  %v476_v34 = vld [vmem:[#allocation3 + $0x5] sm:$0x1] }
 0x1ec   :  { %v484_v40 = vmul.f32 %v1123_v31, %v476_v34 }
 0x1ed   :  { %522 = vst.msk [vmem:[#allocation3 + $0x2] sm:$0x1] %vm51_vm1, %v513_v39 }
 0x1f2   :  { %v492_v43 = vpop.xlane.xlu2 %491 }
 0x1f3   :  { %v512_v44 = vadd.f32 %v492_v43, %v480_v42 }
 0x1f4   :  { %v814_v22 = vld [vmem:[#allocation3 + $0x2] sm:$0x1] }
 0x1f5   :  { %521 = vst.msk [vmem:[#allocation3 + $0x1] sm:$0x1] %vm51_vm1, %v512_v44  ;;  %834 = vperm.xlu0 %1090, %v814_v22  }
 0x1f9   :  { %v658_v51 = vpop.f32.mrf.mxu2 }
 0x1fa   :  { %v778_v18 = vadd.f32 %v658_v51, %v586_v49 }
 0x1fb   :  { %v635_v53 = vpop.f32.mrf.mxu1 }
 0x1fc   :  { %787 = vst.msk [vmem:[#allocation4 + $0x2] sm:$0x1] %vm68_vm11, %v778_v18  ;;  %v777_v29 = vadd.f32 %v635_v53, %v585_v52  ;;  %v489_v55 = vpop.xlane.xlu0 %488  ;;  %v813_v56 = vld [vmem:[#allocation3 + $0x1] sm:$0x1] }
 0x1fd   :  { %v511_v57 = vadd.f32 %v489_v55, %v479_v54  ;;  %828 = vperm.xlu1 %1091, %v813_v56  }
 0x1fe   :  { %786 = vst.msk [vmem:[#allocation4 + $0x1] sm:$0x1] %vm68_vm11, %v777_v29 }
 0x1ff   :  { %520 = vst.msk [vmem:[#allocation3] sm:$0x1] %vm51_vm1, %v511_v57 }
 0x204   :  { %v501_v61 = vpop.xlane.xlu0 %500 }
 0x205   :  { %v515_v28 = vadd.f32 %v501_v61, %v483_v59  ;;  %v612_v1 = vpop.f32.mrf.mxu0 }
 0x206   :  { %v776_v3 = vadd.f32 %v612_v1, %v584_v62  ;;  %v812_v8 = vld [vmem:[#allocation3] sm:$0x1] }
 0x207   :  { %524 = vst.msk [vmem:[#allocation3 + $0x4] sm:$0x1] %vm51_vm1, %v515_v28  ;;  %822 = vperm.xlu2 %1089, %v812_v8  }
 0x208   :  { %785 = vst.msk [vmem:[#allocation4] sm:$0x1] %vm68_vm11, %v776_v3 }
 0x20a   :  { %v498_v4 = vpop.xlane.xlu2 %497 }
 0x20b   :  { %v514_v10 = vadd.f32 %v498_v4, %v482_v60 }
 0x20d   :  { %523 = vst.msk [vmem:[#allocation3 + $0x3] sm:$0x1] %vm51_vm1, %v514_v10  ;;  %v704_v14 = vpop.f32.mrf.mxu0  ;;  %v806_v10 = vld [vmem:[#allocation4 + $0x2] sm:$0x1] }
 0x20e   :  { %v780_v24 = vadd.f32 %v704_v14, %v588_v7  ;;  %v816_v15 = vld [vmem:[#allocation3 + $0x4] sm:$0x1] }
 0x20f   :  { %846 = vperm.xlu1 %1091, %v816_v15   ;;  %v804_v59 = vld [vmem:[#allocation4] sm:$0x1] }
 0x210   :  { %789 = vst.msk [vmem:[#allocation4 + $0x4] sm:$0x1] %vm68_vm11, %v780_v24 }
 0x212   :  { %v507_v21 = vpop.xlane.xlu2 %506 }
 0x213   :  { %v517_v23 = vadd.f32 %v507_v21, %v485_v32  ;;  %v510_v25 = vpop.xlane.xlu0 %509 }
 0x214   :  { %v518_v5 = vadd.f32 %v510_v25, %v486_v38  ;;  %v815_v6 = vld [vmem:[#allocation3 + $0x3] sm:$0x1] }
 0x215   :  { %526 = vst.msk [vmem:[#allocation3 + $0x6] sm:$0x1] %vm51_vm1, %v517_v23  ;;  %840 = vperm.xlu2 %1089, %v815_v6   ;;  %v534_v23 = vld [vmem:[#allocation4 + $0x6] sm:$0x1] }
 0x216   :  { %527 = vst.msk [vmem:[#allocation3 + $0x7] sm:$0x1] %vm51_vm1, %v518_v5 }
 0x219   :  { %v681_v37 = vpop.f32.mrf.mxu3 }
 0x21a   :  { %v779_v39 = vadd.f32 %v681_v37, %v587_v35 }
 0x21b   :  { %v504_v41 = vpop.xlane.xlu1 %503 }
 0x21c   :  { %788 = vst.msk [vmem:[#allocation4 + $0x3] sm:$0x1] %vm68_vm11, %v779_v39  ;;  %v516_v42 = vadd.f32 %v504_v41, %v484_v40  ;;  %v818_v43 = vld [vmem:[#allocation3 + $0x6] sm:$0x1]  ;;  %v805_v39 = vld [vmem:[#allocation4 + $0x1] sm:$0x1] }
 0x21d   :  { %v819_v33 = vld [vmem:[#allocation3 + $0x7] sm:$0x1]  ;;  %858 = vperm.xlu2 %1089, %v818_v43  }
 0x21e   :  { %525 = vst.msk [vmem:[#allocation3 + $0x5] sm:$0x1] %vm51_vm1, %v516_v42  ;;  %864 = vperm.xlu1 %1091, %v819_v33   ;;  %v750_v33 = vpop.f32.mrf.mxu2 }
 0x225   :  { %v817_v44 = vld [vmem:[#allocation3 + $0x5] sm:$0x1]  ;;  %574 = vperm.xlu2 %1089, %v1119_v12  }
 0x226   :  { %580 = vperm.xlu1 %1091, %v1121_v19   ;;  %852 = vperm.xlu0 %1090, %v817_v44  }
 0x22e   :  { %568 = vperm.xlu0 %1090, %v1123_v31  }
 0x261   :  { %v823_v45 = vpop.permute.xlu2 %822 }
 0x262   :  { %v825_v46 = vperm.slane %v823_v45, 0  ;;  %v807_v45 = vld [vmem:[#allocation4 + $0x3] sm:$0x1] }
 0x264   :  { %1124 = vrcp.f32 %v825_v46  ;;  %v879_v50 = vand.u32 2147483648, %v825_v46  ;;  %v877_v18 = vand.u32 2147483647, %v825_v46  ;;  %vm873_vm13 = vweird.f32 %v825_v46 }
 0x266   :  { %v880_v36 = vor.u32 1.1754944e-38, %v879_v50  ;;  %vm878_vm15 = vcmp.eq.f32.partialorder %v877_v18, 8.507059e+37 }
 0x267   :  { %v835_v22 = vpop.permute.xlu0 %834 }
 0x268   :  { %v837_v47 = vperm.slane %v835_v22, 0 }
 0x26a   :  { %v1125_v48 = vpop.eup %1124  ;;  %1126 = vrcp.f32 %v837_v47  ;;  %v909_v61 = vand.u32 2147483648, %v837_v47  ;;  %v907_v28 = vand.u32 2147483647, %v837_v47  ;;  %vm903_vm2 = vweird.f32 %v837_v47 }
 0x26b   :  { %v869_v13 = vmul.f32 %v1125_v48, %v825_v46  ;;  %vm874_vm12 = vweird.f32 %v1125_v48 }
 0x26c   :  { %vm875_vm14 = vmor %vm873_vm13, %vm874_vm12  ;;  %v910_v9 = vor.u32 1.1754944e-38, %v909_v61  ;;  %vm908_vm4 = vcmp.eq.f32.partialorder %v907_v28, 8.507059e+37  ;;  %v808_v28 = vld [vmem:[#allocation4 + $0x4] sm:$0x1] }
 0x26d   :  { %v870_v49 = vsub.f32 1.0, %v869_v13 }
 0x26f   :  { %v871_v51 = vmul.f32 %v1125_v48, %v870_v49  ;;  %v829_v52 = vpop.permute.xlu1 %828  ;;  %v841_v53 = vpop.permute.xlu2 %840 }
 0x270   :  { %v1127_v54 = vpop.eup %1126  ;;  %v831_v29 = vperm.slane %v829_v52, 0  ;;  %v843_v55 = vperm.slane %v841_v53, 0 }
 0x271   :  { %v872_v56 = vadd.f32 %v1125_v48, %v871_v51  ;;  %v899_v57 = vmul.f32 %v1127_v54, %v837_v47  ;;  %vm904_vm1 = vweird.f32 %v1127_v54 }
 0x272   :  { %1128 = vrcp.f32 %v831_v29  ;;  %vm905_vm3 = vmor %vm903_vm2, %vm904_vm1  ;;  %v892_v24 = vand.u32 2147483647, %v831_v29  ;;  %v894_v15 = vand.u32 2147483648, %v831_v29  ;;  %v922_v20 = vand.u32 2147483647, %v843_v55 }
 0x273   :  { %v876_v58 = vsel %vm875_vm14, %v1125_v48, %v872_v56  ;;  %v900_v17 = vsub.f32 1.0, %v899_v57  ;;  %1130 = vrcp.f32 %v843_v55  ;;  %v924_v32 = vand.u32 2147483648, %v843_v55 }
 0x274   :  { %v881_v30 = vsel %vm878_vm15, %v880_v36, %v876_v58  ;;  %vm888_vm7 = vweird.f32 %v831_v29  ;;  %vm918_vm8 = vweird.f32 %v843_v55  ;;  %vm893_vm10 = vcmp.eq.f32.partialorder %v892_v24, 8.507059e+37 }
 0x275   :  { %v882_v62 = vmul.f32 %v881_v30, %v804_v59  ;;  %v901_v63 = vmul.f32 %v1127_v54, %v900_v17  ;;  %v895_v5 = vor.u32 1.1754944e-38, %v894_v15  ;;  %vm923_vm13 = vcmp.eq.f32.partialorder %v922_v20, 8.507059e+37 }
 0x276   :  { %v925_v34 = vor.u32 1.1754944e-38, %v924_v32 }
 0x277   :  { %996 = vst [vmem:[#allocation1] ss:$9 sm:$0xff] %v882_v62  ;;  %v902_v1 = vadd.f32 %v1127_v54, %v901_v63  ;;  %v859_v3 = vpop.permute.xlu2 %858 }
 0x278   :  { %v1129_v8 = vpop.eup %1128  ;;  %v1484_v26 = vperm.slane %v859_v3, 0 }
 0x279   :  { %v1131_v60 = vpop.eup %1130  ;;  %v906_v2 = vsel %vm905_vm3, %v1127_v54, %v902_v1  ;;  %v884_v4 = vmul.f32 %v1129_v8, %v831_v29  ;;  %vm889_vm5 = vweird.f32 %v1129_v8 }
 0x27a   :  { %v911_v7 = vsel %vm908_vm4, %v910_v9, %v906_v2  ;;  %v914_v11 = vmul.f32 %v1131_v60, %v843_v55  ;;  %1132 = vrcp.f32 %v1484_v26  ;;  %vm919_vm6 = vweird.f32 %v1131_v60  ;;  %vm890_vm9 = vmor %vm888_vm7, %vm889_vm5  ;;  %v535_v2 = vld [vmem:[#allocation4 + $0x7] sm:$0x1] }
 0x27b   :  { %v912_v14 = vmul.f32 %v911_v7, %v806_v10  ;;  %v885_v12 = vsub.f32 1.0, %v884_v4  ;;  %vm920_vm12 = vmor %vm918_vm8, %vm919_vm6  ;;  %v969_v50 = vand.u32 2147483648, %v1484_v26  ;;  %vm963_vm15 = vweird.f32 %v1484_v26 }
 0x27c   :  { %v915_v16 = vsub.f32 1.0, %v914_v11  ;;  %v967_v51 = vand.u32 2147483647, %v1484_v26 }
 0x27d   :  { %1000 = vst [vmem:[#allocation1 + $0x2] ss:$9 sm:$0xff] %v912_v14  ;;  %v886_v19 = vmul.f32 %v1129_v8, %v885_v12  ;;  %v970_v54 = vor.u32 1.1754944e-38, %v969_v50  ;;  %v773_v14 = vpop.f32.mrf.mxu3 }
 0x27e   :  { %v916_v21 = vmul.f32 %v1131_v60, %v915_v16  ;;  %vm968_vm2 = vcmp.eq.f32.partialorder %v967_v51, 8.507059e+37  ;;  %v533_v16 = vld [vmem:[#allocation4 + $0x5] sm:$0x1] }
 0x27f   :  { %v887_v38 = vadd.f32 %v1129_v8, %v886_v19  ;;  %v575_v25 = vpop.permute.xlu2 %574 }
 0x280   :  { %v1133_v0 = vpop.eup %1132  ;;  %v917_v6 = vadd.f32 %v1131_v60, %v916_v21  ;;  %v577_v27 = vperm.slane %v575_v25, 0 }
 0x281   :  { %v891_v31 = vsel %vm890_vm9, %v1129_v8, %v887_v38  ;;  %v959_v35 = vmul.f32 %v1133_v0, %v1484_v26  ;;  %v847_v37 = vpop.permute.xlu1 %846  ;;  %vm964_vm14 = vweird.f32 %v1133_v0 }
 0x282   :  { %v896_v40 = vsel %vm893_vm10, %v895_v5, %v891_v31  ;;  %v921_v41 = vsel %vm920_vm12, %v1131_v60, %v917_v6  ;;  %v590_v42 = vmul.f32 %v577_v27, %v534_v23  ;;  %v849_v43 = vperm.slane %v847_v37, 0  ;;  %vm965_vm1 = vmor %vm963_vm15, %vm964_vm14 }
 0x283   :  { %v897_v44 = vmul.f32 %v896_v40, %v805_v39  ;;  %v926_v46 = vsel %vm923_vm13, %v925_v34, %v921_v41  ;;  %v960_v22 = vsub.f32 1.0, %v959_v35 }
 0x284   :  { %v927_v47 = vmul.f32 %v926_v46, %v807_v45  ;;  %v782_v48 = vadd.f32 %v750_v33, %v590_v42  ;;  %1134 = vrcp.f32 %v849_v43  ;;  %v939_v57 = vand.u32 2147483648, %v849_v43 }
 0x285   :  { %998 = vst [vmem:[#allocation1 + $0x1] ss:$9 sm:$0xff] %v897_v44  ;;  %v961_v13 = vmul.f32 %v1133_v0, %v960_v22  ;;  %v937_v17 = vand.u32 2147483647, %v849_v43  ;;  %vm933_vm4 = vweird.f32 %v849_v43 }
 0x286   :  { %1002 = vst [vmem:[#allocation1 + $0x3] ss:$9 sm:$0xff] %v927_v47  ;;  %v940_v62 = vor.u32 1.1754944e-38, %v939_v57 }
 0x287   :  { %v962_v49 = vadd.f32 %v1133_v0, %v961_v13  ;;  %791 = vst.msk [vmem:[#allocation4 + $0x6] sm:$0x1] %vm68_vm11, %v782_v48  ;;  %vm938_vm6 = vcmp.eq.f32.partialorder %v937_v17, 8.507059e+37 }
 0x289   :  { %v966_v52 = vsel %vm965_vm1, %v1133_v0, %v962_v49  ;;  %v727_v0 = vpop.f32.mrf.mxu1 }
 0x28a   :  { %v1135_v18 = vpop.eup %1134  ;;  %v971_v55 = vsel %vm968_vm2, %v970_v54, %v966_v52 }
 0x28b   :  { %v929_v53 = vmul.f32 %v1135_v18, %v849_v43  ;;  %vm934_vm3 = vweird.f32 %v1135_v18 }
 0x28c   :  { %vm935_vm5 = vmor %vm933_vm4, %vm934_vm3 }
 0x28d   :  { %v930_v29 = vsub.f32 1.0, %v929_v53 }
 0x28e   :  { %v810_v56 = vld [vmem:[#allocation4 + $0x6] sm:$0x1] }
 0x28f   :  { %v972_v36 = vmul.f32 %v971_v55, %v810_v56  ;;  %v931_v58 = vmul.f32 %v1135_v18, %v930_v29 }
 0x290   :  { %v865_v59 = vpop.permute.xlu1 %864 }
 0x291   :  { %1008 = vst [vmem:[#allocation1 + $0x6] ss:$9 sm:$0xff] %v972_v36  ;;  %v932_v30 = vadd.f32 %v1135_v18, %v931_v58  ;;  %v867_v61 = vperm.slane %v865_v59, 0 }
 0x293   :  { %v936_v63 = vsel %vm935_vm5, %v1135_v18, %v932_v30  ;;  %1136 = vrcp.f32 %v867_v61  ;;  %v984_v32 = vand.u32 2147483648, %v867_v61  ;;  %vm978_vm8 = vweird.f32 %v867_v61 }
 0x294   :  { %v941_v1 = vsel %vm938_vm6, %v940_v62, %v936_v63  ;;  %v982_v38 = vand.u32 2147483647, %v867_v61 }
 0x295   :  { %v942_v3 = vmul.f32 %v941_v1, %v808_v28  ;;  %v985_v27 = vor.u32 1.1754944e-38, %v984_v32 }
 0x296   :  { %vm983_vm10 = vcmp.eq.f32.partialorder %v982_v38, 8.507059e+37 }
 0x297   :  { %1004 = vst [vmem:[#allocation1 + $0x4] ss:$9 sm:$0xff] %v942_v3 }
 0x298   :  { %v853_v8 = vpop.permute.xlu0 %852  ;;  %v581_v9 = vpop.permute.xlu1 %580 }
 0x299   :  { %v1137_v26 = vpop.eup %1136  ;;  %v855_v60 = vperm.slane %v853_v8, 0  ;;  %v583_v4 = vperm.slane %v581_v9, 0 }
 0x29a   :  { %v974_v10 = vmul.f32 %v1137_v26, %v867_v61  ;;  %vm979_vm7 = vweird.f32 %v1137_v26 }
 0x29b   :  { %1138 = vrcp.f32 %v855_v60  ;;  %v591_v11 = vmul.f32 %v583_v4, %v535_v2  ;;  %vm980_vm9 = vmor %vm978_vm8, %vm979_vm7  ;;  %v954_v40 = vand.u32 2147483648, %v855_v60  ;;  %vm948_vm13 = vweird.f32 %v855_v60 }
 0x29c   :  { %v975_v7 = vsub.f32 1.0, %v974_v10  ;;  %v952_v42 = vand.u32 2147483647, %v855_v60 }
 0x29d   :  { %v783_v24 = vadd.f32 %v773_v14, %v591_v11  ;;  %v955_v33 = vor.u32 1.1754944e-38, %v954_v40 }
 0x29e   :  { %v976_v12 = vmul.f32 %v1137_v26, %v975_v7  ;;  %vm953_vm15 = vcmp.eq.f32.partialorder %v952_v42, 8.507059e+37 }
 0x29f   :  { %792 = vst.msk [vmem:[#allocation4 + $0x7] sm:$0x1] %vm68_vm11, %v783_v24 }
 0x2a0   :  { %v977_v15 = vadd.f32 %v1137_v26, %v976_v12  ;;  %v569_v19 = vpop.permute.xlu0 %568 }
 0x2a1   :  { %v1139_v20 = vpop.eup %1138  ;;  %v571_v21 = vperm.slane %v569_v19, 0 }
 0x2a2   :  { %v944_v23 = vmul.f32 %v1139_v20, %v855_v60  ;;  %v981_v5 = vsel %vm980_vm9, %v1137_v26, %v977_v15  ;;  %vm949_vm12 = vweird.f32 %v1139_v20 }
 0x2a3   :  { %v589_v25 = vmul.f32 %v571_v21, %v533_v16  ;;  %v986_v35 = vsel %vm983_vm10, %v985_v27, %v981_v5  ;;  %vm950_vm14 = vmor %vm948_vm13, %vm949_vm12 }
 0x2a4   :  { %v945_v6 = vsub.f32 1.0, %v944_v23 }
 0x2a5   :  { %v781_v31 = vadd.f32 %v727_v0, %v589_v25 }
 0x2a6   :  { %v946_v34 = vmul.f32 %v1139_v20, %v945_v6  ;;  %v811_v37 = vld [vmem:[#allocation4 + $0x7] sm:$0x1] }
 0x2a7   :  { %790 = vst.msk [vmem:[#allocation4 + $0x5] sm:$0x1] %vm68_vm11, %v781_v31  ;;  %v987_v41 = vmul.f32 %v986_v35, %v811_v37 }
 0x2a8   :  { %v947_v39 = vadd.f32 %v1139_v20, %v946_v34 }
 0x2a9   :  { %1010 = vst [vmem:[#allocation1 + $0x7] ss:$9 sm:$0xff] %v987_v41 }
 0x2aa   :  { %v951_v43 = vsel %vm950_vm14, %v1139_v20, %v947_v39 }
 0x2ab   :  { %v956_v44 = vsel %vm953_vm15, %v955_v33, %v951_v43 }
 0x2ae   :  { %v809_v45 = vld [vmem:[#allocation4 + $0x5] sm:$0x1] }
 0x2af   :  { %v957_v46 = vmul.f32 %v956_v44, %v809_v45 }
 0x2b1   :  { %1006 = vst [vmem:[#allocation1 + $0x5] ss:$9 sm:$0xff] %v957_v46 }
 0x2b8   :  { %v1011_v22 = vld [vmem:[#allocation1] sm:$0xff] }
 0x2b9   :  { %1013 = vst.msk [vmem:[#allocation10] sm:$0xff] %vm93_vm0, %v1011_v22 }
 0x2ba   :  { %1017 = vsyncadd [#allocation7], 96  ;;  %s1020_s26 = sshll.u32 %s1503_s2, 4  ;;  %s1253_s27 = smov [#allocation10]   ;;  %s1021_s26 = int_to_ptr.hbm [resolvable:$true] %s1020_s26 }
 0x2bb   :  { %s1018_s28 = sshll.u32 %s1253_s27, 4  ;;  %s1254_s29 = smov 32   ;;  %s1019_s28 = int_to_ptr.vmem [resolvable:$true] %s1018_s28 }
 0x2bc   :  { %s1255_s30 = smov 2  }
 0x2bd   :  { %1026 = dma.vmem_to_hbm [thread:$0]  %s1019_s28, 32, %s1021_s26, [#allocation7], %s1254_s29, %s1254_s29, %s1255_s30  }
 0x2be   :  { %1030 = vsyncadd [#allocation12], 96  ;;  %s1033_s6 = sshll.u32 %s1504_s3, 4  ;;  %s1256_s7 = smov [#allocation11]   ;;  %s1034_s6 = int_to_ptr.hbm [resolvable:$true] %s1033_s6 }
 0x2bf   :  { %s1031_s8 = sshll.u32 %s1256_s7, 4  ;;  %s1032_s8 = int_to_ptr.vmem [resolvable:$true] %s1031_s8 }
 0x2c0   :  { %1039 = dma.vmem_to_hbm [thread:$0]  %s1032_s8, 32, %s1034_s6, [#allocation12], %s1254_s29, %s1254_s29, %s1255_s30  }
 0x2c1   :  { %1240 = dma.done.wait [#allocation7], 128  }
 0x2c2   :  { %1241 = vsyncadd [#allocation7], 4294967168 }
 0x2c3   :  { %1242 = dma.done.wait [#allocation12], 128  }
 0x2c4   :  { %1243 = vsyncadd [#allocation12], 4294967168 }
 0x2c5   :  { %1048 = vsyncpa [#allocation6], 1 }
 0x2c6   :  { %1049 = vsyncpa [#allocation9], 1 }
 0x2c7   :  { %1050 = vsyncpa [#allocation7], 1 }
 0x2c8   :  { %1051 = vsyncpa [#allocation12], 1 }

</bundles_post_ra>
